<compile_context>
chip_gen: v6e
topology: v6e:2x2x1
jax: 0.10.0
libtpu: 0.0.40
codegen_flags: <defaults>
</compile_context>

<pallas_src>
import jax
import jax.numpy as jnp
from jax.experimental import pallas as pl
from jax.experimental.pallas import tpu as pltpu

IN_FEATURES = 784          # 28 * 28
HIDDEN = 128
TB_DEFAULT = 2048          # batch tile (multiple of 256; ~27 MiB/step in VMEM)


def _round_up(n, m):
    return (n + m - 1) // m * m


def _mlp_kernel(x_ref, w1_ref, b1_ref, w2_ref, b2_ref, o_ref):
    # x_ref : (TB, 784) f32     w1_ref: (784, 128) bf16   b1_ref: (1, 128) f32
    # w2_ref: (128, 784) bf16   b2_ref: (1, 784)   f32    o_ref : (TB, 784) f32
    x = x_ref[...].astype(jnp.bfloat16)            # fused cast (VPU, hidden under DMA)
    # Linear 1: MXU (bf16 in / f32 acc) + bias + ReLU (VPU, f32)
    h = jnp.dot(x, w1_ref[...], preferred_element_type=jnp.float32)
    h = jnp.maximum(h + b1_ref[...], 0.0)
    # Linear 2: MXU (bf16 in / f32 acc) + bias
    y = jnp.dot(h.astype(jnp.bfloat16), w2_ref[...],
                preferred_element_type=jnp.float32)
    o_ref[...] = (y + b2_ref[...]).astype(o_ref.dtype)


def prepare_params(w1, b1, w2, b2):
    """One-time conversion of params to the kernel's layout/dtypes.

    w1: (784, 128), b1: (128,), w2: (128, 784), b2: (784,).
    Hoisted out of the per-call path so f32->bf16 weight copies are not
    re-materialized on every forward.
    """
    return (w1.astype(jnp.bfloat16),
            b1.reshape(1, HIDDEN).astype(jnp.float32),
            w2.astype(jnp.bfloat16),
            b2.reshape(1, IN_FEATURES).astype(jnp.float32))


def diffusion_model_forward(x, params, *, tb=TB_DEFAULT):
    """Forward pass equivalent to DiffusionModel.forward.

    x : (B, 1, 28, 28) float32  ->  (B, 1, 28, 28) float32
    params: output of prepare_params().
    """
    w1_bf, b1_row, w2_bf, b2_row = params
    B = x.shape[0]
    x_flat = x.reshape(B, IN_FEATURES)             # f32, no cast / feature pad

    # --- batch tiling ------------------------------------------------------
    # Keep at least 2 grid steps so "parallel" can use both v7x TensorCores;
    # round tiles to a multiple of 16 (bf16 sublane packing of intermediates).
    if B <= tb:
        tb_eff = _round_up(max(pl.cdiv(B, 2), 16), 16)
        b_pad = 2 * tb_eff
    else:
        tb_eff = tb
        b_pad = _round_up(B, tb_eff)
    grid = (b_pad // tb_eff,)

    if b_pad != B:                                 # only pad rows when needed
        x_flat = jnp.pad(x_flat, ((0, b_pad - B), (0, 0)))

    cost = pl.CostEstimate(
        flops=4 * b_pad * IN_FEATURES * HIDDEN,            # two matmuls
        transcendentals=0,
        bytes_accessed=(2 * b_pad * IN_FEATURES * 4        # f32 x in + f32 out
                        + w1_bf.size * 2 + w2_bf.size * 2  # bf16 weights
                        + b1_row.size * 4 + b2_row.size * 4),
    )

    out_p = pl.pallas_call(
        _mlp_kernel,
        out_shape=jax.ShapeDtypeStruct((b_pad, IN_FEATURES), jnp.float32),
        grid_spec=pltpu.PrefetchScalarGridSpec(
            num_scalar_prefetch=0,
            grid=grid,
            in_specs=[
                # x: streamed per batch tile; 784 == full feature dim -> legal block
                pl.BlockSpec((tb_eff, IN_FEATURES), lambda i: (i, 0)),
                # weights / biases: constant index_map -> VMEM-resident, no re-DMA
                pl.BlockSpec((IN_FEATURES, HIDDEN), lambda i: (0, 0)),
                pl.BlockSpec((1, HIDDEN), lambda i: (0, 0)),
                pl.BlockSpec((HIDDEN, IN_FEATURES), lambda i: (0, 0)),
                pl.BlockSpec((1, IN_FEATURES), lambda i: (0, 0)),
            ],
            out_specs=pl.BlockSpec((tb_eff, IN_FEATURES), lambda i: (i, 0)),
        ),
        compiler_params=pltpu.CompilerParams(
            dimension_semantics=("parallel",),
            vmem_limit_bytes=48 * 1024 * 1024,
        ),
        cost_estimate=cost,
    )(x_flat, w1_bf, b1_row, w2_bf, b2_row)

    out = out_p if b_pad == B else out_p[:B]       # drop padded batch rows only
    return out.reshape(B, 1, 28, 28)


def init_params(key):
    """Deterministic init mirroring torch.nn.Linear shapes.

    linear1: weight (128, 784), bias (128,)  -> stored transposed as (784, 128)
    linear2: weight (784, 128), bias (784,)  -> stored transposed as (128, 784)
    PyTorch uses U(-1/sqrt(fan_in), 1/sqrt(fan_in)); replicated with JAX PRNG.
    """
    k1, k2, k3, k4 = jax.random.split(key, 4)
    bound1 = 1.0 / jnp.sqrt(784.0)
    bound2 = 1.0 / jnp.sqrt(128.0)
    w1 = jax.random.uniform(k1, (IN_FEATURES, HIDDEN), jnp.float32, -bound1, bound1)
    b1 = jax.random.uniform(k2, (HIDDEN,), jnp.float32, -bound1, bound1)
    w2 = jax.random.uniform(k3, (HIDDEN, IN_FEATURES), jnp.float32, -bound2, bound2)
    b2 = jax.random.uniform(k4, (IN_FEATURES,), jnp.float32, -bound2, bound2)
    return w1, b1, w2, b2


def _reference(x, w1, b1, w2, b2):
    B = x.shape[0]
    xf = x.reshape(B, IN_FEATURES)
    h = jnp.maximum(xf @ w1 + b1[None, :], 0.0)
    y = h @ w2 + b2[None, :]
    return y.reshape(B, 1, 28, 28)


if __name__ == "__main__":
    key = jax.random.PRNGKey(0)
    k_x, k_p = jax.random.split(key)

    B = 2
    x = jax.random.normal(k_x, (B, 1, 28, 28), dtype=jnp.float32)
    w1, b1, w2, b2 = init_params(k_p)

    params = prepare_params(w1, b1, w2, b2)        # hoisted one-time conversion
    fwd = jax.jit(diffusion_model_forward)

    out = fwd(x, params)
    out = jax.block_until_ready(out)

    ref = _reference(x, w1, b1, w2, b2)
    assert out.shape == (B, 1, 28, 28), out.shape
    # bf16 MXU inputs (f32 accumulation) -> small drift vs the f32 reference.
    assert jnp.allclose(out, ref, atol=3e-2, rtol=3e-2), "mismatch vs reference"

    print("KERNEL_OK")
</pallas_src>

<mosaic_0001>
module attributes {stable_mosaic.version = 11 : i64} {
  func.func @_mlp_kernel(%arg0: i32, %arg1: memref<16x784xf32, #tpu.memory_space<vmem>>, %arg2: memref<784x128xbf16, #tpu.memory_space<vmem>>, %arg3: memref<1x128xf32, #tpu.memory_space<vmem>>, %arg4: memref<128x784xbf16, #tpu.memory_space<vmem>>, %arg5: memref<1x784xf32, #tpu.memory_space<vmem>>, %arg6: memref<16x784xf32, #tpu.memory_space<vmem>>) attributes {dimension_semantics = [#tpu.dimension_semantics<parallel>], iteration_bounds = array<i64: 2>, scalar_prefetch = 0 : i64, scratch_operands = 0 : i64, tpu.core_type = #tpu.core_type<tc>, window_params = [{transform_indices = @transform_0, window_bounds = array<i64: 16, 784>}, {pipeline_mode = #tpu.pipeline_mode<synchronous>, transform_indices = @transform_1, window_bounds = array<i64: 784, 128>}, {pipeline_mode = #tpu.pipeline_mode<synchronous>, transform_indices = @transform_2, window_bounds = array<i64: 1, 128>}, {pipeline_mode = #tpu.pipeline_mode<synchronous>, transform_indices = @transform_3, window_bounds = array<i64: 128, 784>}, {pipeline_mode = #tpu.pipeline_mode<synchronous>, transform_indices = @transform_4, window_bounds = array<i64: 1, 784>}, {transform_indices = @transform_5, window_bounds = array<i64: 16, 784>}]} {
    %c0 = arith.constant 0 : index
    %c0_0 = arith.constant 0 : index
    %0 = vector.load %arg1[%c0, %c0_0] : memref<16x784xf32, #tpu.memory_space<vmem>>, vector<16x784xf32>
    %1 = arith.truncf %0 : vector<16x784xf32> to vector<16x784xbf16>
    %c0_1 = arith.constant 0 : index
    %c0_2 = arith.constant 0 : index
    %2 = vector.load %arg2[%c0_1, %c0_2] : memref<784x128xbf16, #tpu.memory_space<vmem>>, vector<784x128xbf16>
    %cst = arith.constant dense<0.000000e+00> : vector<16x128xf32>
    %3 = tpu.matmul %1, %2, %cst {dimension_numbers = #tpu.dot_dimension_numbers<[1], [0], [0], [1], [0, 0, 1, 1], [], []>} : vector<16x784xbf16>, vector<784x128xbf16>, vector<16x128xf32> -> vector<16x128xf32>
    %c0_3 = arith.constant 0 : index
    %c0_4 = arith.constant 0 : index
    %4 = vector.load %arg3[%c0_3, %c0_4] : memref<1x128xf32, #tpu.memory_space<vmem>>, vector<1x128xf32>
    %5 = vector.broadcast %4 : vector<1x128xf32> to vector<16x128xf32>
    %6 = arith.addf %3, %5 : vector<16x128xf32>
    %cst_5 = arith.constant 0.000000e+00 : f32
    %7 = vector.broadcast %cst_5 : f32 to vector<16x128xf32>
    %8 = arith.maximumf %6, %7 : vector<16x128xf32>
    %9 = arith.truncf %8 : vector<16x128xf32> to vector<16x128xbf16>
    %c0_6 = arith.constant 0 : index
    %c0_7 = arith.constant 0 : index
    %10 = vector.load %arg4[%c0_6, %c0_7] : memref<128x784xbf16, #tpu.memory_space<vmem>>, vector<128x784xbf16>
    %cst_8 = arith.constant dense<0.000000e+00> : vector<16x784xf32>
    %11 = tpu.matmul %9, %10, %cst_8 {dimension_numbers = #tpu.dot_dimension_numbers<[1], [0], [0], [1], [0, 0, 1, 1], [], []>} : vector<16x128xbf16>, vector<128x784xbf16>, vector<16x784xf32> -> vector<16x784xf32>
    %c0_9 = arith.constant 0 : index
    %c0_10 = arith.constant 0 : index
    %12 = vector.load %arg5[%c0_9, %c0_10] : memref<1x784xf32, #tpu.memory_space<vmem>>, vector<1x784xf32>
    %13 = vector.broadcast %12 : vector<1x784xf32> to vector<16x784xf32>
    %14 = arith.addf %11, %13 : vector<16x784xf32>
    %c0_11 = arith.constant 0 : index
    %c0_12 = arith.constant 0 : index
    %15 = vector.load %arg6[%c0_11, %c0_12] : memref<16x784xf32, #tpu.memory_space<vmem>>, vector<16x784xf32>
    tpu.vector_store %arg6[%c0_11, %c0_12], %14 {strides = array<i32>} : memref<16x784xf32, #tpu.memory_space<vmem>>, vector<16x784xf32>,
    return
  }
  func.func @transform_0(%arg0: i32) -> (i32, i32) {
    %c0_i32 = arith.constant 0 : i32
    %c0_i32_0 = arith.constant 0 : i32
    return %arg0, %c0_i32 : i32, i32
  }
  func.func @transform_1(%arg0: i32) -> (i32, i32) {
    %c0_i32 = arith.constant 0 : i32
    %c0_i32_0 = arith.constant 0 : i32
    %c0_i32_1 = arith.constant 0 : i32
    return %c0_i32, %c0_i32_0 : i32, i32
  }
  func.func @transform_2(%arg0: i32) -> (i32, i32) {
    %c0_i32 = arith.constant 0 : i32
    %c0_i32_0 = arith.constant 0 : i32
    %c0_i32_1 = arith.constant 0 : i32
    return %c0_i32, %c0_i32_0 : i32, i32
  }
  func.func @transform_3(%arg0: i32) -> (i32, i32) {
    %c0_i32 = arith.constant 0 : i32
    %c0_i32_0 = arith.constant 0 : i32
    %c0_i32_1 = arith.constant 0 : i32
    return %c0_i32, %c0_i32_0 : i32, i32
  }
  func.func @transform_4(%arg0: i32) -> (i32, i32) {
    %c0_i32 = arith.constant 0 : i32
    %c0_i32_0 = arith.constant 0 : i32
    %c0_i32_1 = arith.constant 0 : i32
    return %c0_i32, %c0_i32_0 : i32, i32
  }
  func.func @transform_5(%arg0: i32) -> (i32, i32) {
    %c0_i32 = arith.constant 0 : i32
    %c0_i32_0 = arith.constant 0 : i32
    return %arg0, %c0_i32 : i32, i32
  }
}

</mosaic_0001>

<bundles_post_ra>
// kernel: diffusion_model_forward.1
= control target key start
LH: loop header
LB: loop body
LE: loop exit
PB: predicated region body
PF: predicated region fallthrough
CT: control target
= control target key end

     0   :  { %s1859_s18 = smov 0   ;;  %s2254_s0 = inlined_call_operand.vmem [shape: f32[32,784], index: 0, kind: input, shape index: {}]   ;;  %s2255_s1 = inlined_call_operand.vmem [shape: bf16[784,128], index: 1, kind: input, shape index: {}]   ;;  %s2256_s2 = inlined_call_operand.vmem [shape: f32[1,128], index: 2, kind: input, shape index: {}]   ;;  %s2257_s3 = inlined_call_operand.vmem [shape: bf16[128,784], index: 3, kind: input, shape index: {}]   ;;  %s2258_s4 = inlined_call_operand.vmem [shape: f32[1,784], index: 4, kind: input, shape index: {}]   ;;  %s2259_s5 = inlined_call_operand.vmem [shape: f32[32,784], index: 5, kind: output, shape index: {}]  }
   0x1 LB: > { %s1456_s19 = sadd.s32 4294967295, %s1824_s18   ;;  %p1460_p0 = scmp.ge.s32.totalorder %s1824_s18, 1  ;;  %s1824_s18 = sphi %s1859_s18, %s15_s18  }
   0x2   : > { %p189_p1 = scmp.lt.s32.totalorder %s1824_s18, 3 }
   0x4   : > { %p190_p2 = pnand %p1460_p0, %p189_p1 }
   0x5   : > { %s1461_s25 = sshll.u32 (!%p190_p2), %s1456_s19, 1 }
   0x6   : > { %193 = sbr.rel (%p190_p2) target bundleno = 519 (0x207), region = 40  ;;  %p220_p3 = scmp.lt.s32.totalorder (!%p190_p2), %s1461_s25, 3 }
   0xb   : > { %v1689_v0 = vld [vmem:[%s2255_s1 + $0x78] sm:$0xff]   ;;  %v1693_v4 = vld [vmem:[%s2255_s1 + $0x70] sm:$0xff]   ;;  %v1697_v8 = vld [vmem:[%s2255_s1 + $0x68] sm:$0xff]   ;;  %s2261_s25 = smov (!%p220_p3, %s1461_s25), 3  ;;  %v1826_v43 = vmov 0.0   ;;  %vm1827_vm0 = vmmov 0  }
   0xc   : > { %v1690_v1 = vld [vmem:[%s2255_s1 + $0x38] sm:$0xff]   ;;  %1574 = vmatprep.subr.bf16.mxu0 %v1689_v0  ;;  %v1694_v5 = vld [vmem:[%s2255_s1 + $0x30] sm:$0xff]   ;;  %v1698_v9 = vld [vmem:[%s2255_s1 + $0x28] sm:$0xff]   ;;  %s1677_s24 = smul.u32 56, %s2261_s25  ;;  %vm654_vm1 = vcmask 130048  }
   0xd   : > { %v1691_v2 = vld [vmem:[%s2255_s1 + $0xf8] sm:$0xff]   ;;  %1575 = vmatpush3.bf16.msra.mxu0 %v1690_v1  ;;  %v1695_v6 = vld [vmem:[%s2255_s1 + $0xf0] sm:$0xff]   ;;  %v1699_v10 = vld [vmem:[%s2255_s1 + $0xe8] sm:$0xff]  }
   0xe   : > { %v1692_v3 = vld [vmem:[%s2255_s1 + $0xb8] sm:$0xff]   ;;  %1596 = vmatprep.subr.bf16.mxu1 %v1691_v2  ;;  %1576 = vmatprep.subr.bf16.mxu0 %v1693_v4  ;;  %v1696_v7 = vld [vmem:[%s2255_s1 + $0xb0] sm:$0xff]   ;;  %v1700_v11 = vld [vmem:[%s2255_s1 + $0xa8] sm:$0xff]   ;;  %s1964_s10 = scalar_lea.vmem %s2254_s0, %s1677_s24 }
   0xf   : > { %1597 = vmatpush3.bf16.msra.mxu1 %v1692_v3  ;;  %v1701_v12 = vld [vmem:[%s2255_s1 + $0x60] sm:$0xff]   ;;  %v1705_v16 = vld [vmem:[%s2255_s1 + $0x58] sm:$0xff]   ;;  %v1709_v20 = vld [vmem:[%s2255_s1 + $0x50] sm:$0xff]  }
  0x10   : > { %1598 = vmatprep.subr.bf16.mxu1 %v1695_v6  ;;  %v1702_v13 = vld [vmem:[%s2255_s1 + $0x20] sm:$0xff]   ;;  %v1706_v17 = vld [vmem:[%s2255_s1 + $0x18] sm:$0xff]   ;;  %v1710_v21 = vld [vmem:[%s2255_s1 + $0x10] sm:$0xff]  }
  0x11   : > { %1577 = vmatpush3.bf16.msra.mxu0 %v1694_v5  ;;  %v1703_v14 = vld [vmem:[%s2255_s1 + $0xe0] sm:$0xff]   ;;  %v1707_v18 = vld [vmem:[%s2255_s1 + $0xd8] sm:$0xff]   ;;  %v1711_v22 = vld [vmem:[%s2255_s1 + $0xd0] sm:$0xff]  }
  0x12   : > { %1578 = vmatprep.subr.bf16.mxu0 %v1697_v8  ;;  %v1704_v15 = vld [vmem:[%s2255_s1 + $0xa0] sm:$0xff]   ;;  %v1708_v19 = vld [vmem:[%s2255_s1 + $0x98] sm:$0xff]   ;;  %v1712_v23 = vld [vmem:[%s2255_s1 + $0x90] sm:$0xff]  }
  0x13   : > { %1599 = vmatpush3.bf16.msra.mxu1 %v1696_v7  ;;  %v1713_v24 = vld [vmem:[%s2255_s1 + $0x48] sm:$0xff]   ;;  %v1717_v28 = vld [vmem:[%s2255_s1 + $0x40] sm:$0xff]   ;;  %v241_v36 = vld [vmem:[%s1964_s10 + $0x38] sm:$0xff] }
  0x14   : > { %1600 = vmatprep.subr.bf16.mxu1 %v1699_v10  ;;  %v1714_v25 = vld [vmem:[%s2255_s1 + $0x8] sm:$0xff]   ;;  %v1718_v29 = vld [vmem:[%s2255_s1] sm:$0xff]   ;;  %v1721_v38 = vld [vmem:[%s2255_s1 + $0x178] sm:$0xff]  }
  0x15   : > { %1579 = vmatpush3.bf16.msra.mxu0 %v1698_v9  ;;  %v1715_v26 = vld [vmem:[%s2255_s1 + $0xc8] sm:$0xff]   ;;  %v1719_v30 = vld [vmem:[%s2255_s1 + $0xc0] sm:$0xff]   ;;  %v237_v39 = vld [vmem:[%s1964_s10 + $0x18] sm:$0xff] }
  0x16   : > { %1580 = vmatprep.subr.bf16.mxu0 %v1701_v12  ;;  %v1716_v27 = vld [vmem:[%s2255_s1 + $0x88] sm:$0xff]   ;;  %v242_v32 = vld [vmem:[%s1964_s10 + $0x40] sm:$0xff]  ;;  %v244_v40 = vld [vmem:[%s1964_s10 + $0x50] sm:$0xff] }
  0x17   : > { %1601 = vmatpush3.bf16.msra.mxu1 %v1700_v11  ;;  %v235_v31 = vld [vmem:[%s1964_s10 + $0x8] sm:$0xff]  ;;  %v1720_v34 = vld [vmem:[%s2255_s1 + $0x80] sm:$0xff]   ;;  %v251_v41 = vpack.c.bf16 %v244_v40, %v237_v39  ;;  %v1722_v42 = vld [vmem:[%s2255_s1 + $0x138] sm:$0xff]   ;;  %v1828_v40 = vmov 0  }
  0x18   : > { %1602 = vmatprep.subr.bf16.mxu1 %v1703_v14  ;;  %v249_v33 = vpack.c.bf16 %v242_v32, %v235_v31  ;;  %v234_v35 = vld [vmem:[%s1964_s10] sm:$0xff]  ;;  %v236_v44 = vld [vmem:[%s1964_s10 + $0x10] sm:$0xff]  ;;  %v243_v45 = vld [vmem:[%s1964_s10 + $0x48] sm:$0xff] }
  0x19   : > { %1581 = vmatpush3.bf16.msra.mxu0 %v1702_v13  ;;  %v248_v37 = vpack.c.bf16 %v241_v36, %v234_v35  ;;  %731 = vmatprep.mubr.bf16.mxu1 %v251_v41  ;;  %v250_v46 = vpack.c.bf16 %v243_v45, %v236_v44  ;;  %v1723_v47 = vld [vmem:[%s2255_s1 + $0x170] sm:$0xff]   ;;  %v1725_v49 = vld [vmem:[%s2255_s1 + $0x168] sm:$0xff]   ;;  %v1727_v51 = vld [vmem:[%s2255_s1 + $0x160] sm:$0xff]  }
  0x1a   : > { %1582 = vmatprep.subr.bf16.mxu0 %v1705_v16  ;;  %690 = vmatprep.mubr.bf16.mxu0 %v249_v33  ;;  %v1724_v48 = vld [vmem:[%s2255_s1 + $0x130] sm:$0xff]   ;;  %v1726_v50 = vld [vmem:[%s2255_s1 + $0x128] sm:$0xff]   ;;  %v1728_v52 = vld [vmem:[%s2255_s1 + $0x120] sm:$0xff]  }
  0x1b   : > { %1603 = vmatpush3.bf16.msra.mxu1 %v1704_v15  ;;  %v1729_v53 = vld [vmem:[%s2255_s1 + $0x158] sm:$0xff]   ;;  %v1731_v55 = vld [vmem:[%s2255_s1 + $0x150] sm:$0xff]   ;;  %v1737_v56 = vld [vmem:[%s2255_s1 + $0x180] sm:$0xff]  }
  0x1c   : > { %1604 = vmatprep.subr.bf16.mxu1 %v1707_v18  ;;  %v1730_v54 = vld [vmem:[%s2255_s1 + $0x118] sm:$0xff]   ;;  %v239_v57 = vld [vmem:[%s1964_s10 + $0x28] sm:$0xff]  ;;  %v1732_v58 = vld [vmem:[%s2255_s1 + $0x110] sm:$0xff]  }
  0x1d   : > { %1583 = vmatpush3.bf16.msra.mxu0 %v1706_v17  ;;  %v1733_v59 = vld [vmem:[%s2255_s1 + $0x148] sm:$0xff]   ;;  %v246_v60 = vld [vmem:[%s1964_s10 + $0x60] sm:$0xff]  ;;  %v240_v62 = vld [vmem:[%s1964_s10 + $0x30] sm:$0xff] }
  0x1e   : > { %1584 = vmatprep.subr.bf16.mxu0 %v1709_v20  ;;  %v253_v61 = vpack.c.bf16 %v246_v60, %v239_v57  ;;  %v247_v63 = vld [vmem:[%s1964_s10 + $0x68] sm:$0xff]  ;;  %v1735_v2 = vld [vmem:[%s2255_s1 + $0x140] sm:$0xff]   ;;  %v245_v5 = vld [vmem:[%s1964_s10 + $0x58] sm:$0xff] }
  0x1f   : > { %1605 = vmatpush3.bf16.msra.mxu1 %v1708_v19  ;;  %v254_v0 = vpack.c.bf16 %v247_v63, %v240_v62  ;;  %v1734_v1 = vld [vmem:[%s2255_s1 + $0x108] sm:$0xff]   ;;  %v1736_v3 = vld [vmem:[%s2255_s1 + $0x100] sm:$0xff]   ;;  %v1743_v10 = vld [vmem:[%s2257_s3 + $0x194] ss:$28 sps:$4 sm:$0xff]  }
  0x20   : > { %1606 = vmatprep.subr.bf16.mxu1 %v1711_v22  ;;  %v238_v4 = vld [vmem:[%s1964_s10 + $0x20] sm:$0xff]  ;;  %v1740_v8 = vld [vmem:[%s2257_s3 + $0x18c] ss:$28 sps:$4 sm:$0xff]   ;;  %v1746_v11 = vld [vmem:[%s2257_s3 + $0x154] ss:$28 sps:$4 sm:$0xff]   ;;  %s2233_s10 = scalar_lea.vmem %s2259_s5, %s1677_s24 }
  0x21   : > { %1585 = vmatpush3.bf16.msra.mxu0 %v1710_v21  ;;  %v252_v6 = vpack.c.bf16 %v245_v5, %v238_v4  ;;  %v1738_v7 = vld [vmem:[%s2257_s3 + $0x188] ss:$28 sps:$4 sm:$0xff]   ;;  %v1741_v9 = vld [vmem:[%s2257_s3 + $0x190] ss:$28 sps:$4 sm:$0xff]   ;;  %v1749_v12 = vld [vmem:[%s2257_s3 + $0x15c] ss:$28 sps:$4 sm:$0xff]  }
  0x22   : > { %1586 = vmatprep.subr.bf16.mxu0 %v1713_v24  ;;  %v1744_v13 = vld [vmem:[%s2257_s3 + $0x150] ss:$28 sps:$4 sm:$0xff]   ;;  %v1747_v14 = vld [vmem:[%s2257_s3 + $0x158] ss:$28 sps:$4 sm:$0xff]   ;;  %v1755_v16 = vld [vmem:[%s2257_s3 + $0x124] ss:$28 sps:$4 sm:$0xff]  }
  0x23   : > { %1607 = vmatpush3.bf16.msra.mxu1 %v1712_v23  ;;  %v1752_v15 = vld [vmem:[%s2257_s3 + $0x11c] ss:$28 sps:$4 sm:$0xff]   ;;  %v1758_v19 = vld [vmem:[%s2257_s3 + $0xe4] ss:$28 sps:$4 sm:$0xff]   ;;  %v1761_v20 = vld [vmem:[%s2257_s3 + $0xec] ss:$28 sps:$4 sm:$0xff]  }
  0x24   : > { %1608 = vmatprep.subr.bf16.mxu1 %v1715_v26  ;;  %v1750_v17 = vld [vmem:[%s2257_s3 + $0x118] ss:$28 sps:$4 sm:$0xff]   ;;  %v1753_v18 = vld [vmem:[%s2257_s3 + $0x120] ss:$28 sps:$4 sm:$0xff]   ;;  %v1759_v22 = vld [vmem:[%s2257_s3 + $0xe8] ss:$28 sps:$4 sm:$0xff]  }
  0x25   : > { %1587 = vmatpush3.bf16.msra.mxu0 %v1714_v25  ;;  %v1756_v21 = vld [vmem:[%s2257_s3 + $0xe0] ss:$28 sps:$4 sm:$0xff]   ;;  %v1764_v23 = vld [vmem:[%s2257_s3 + $0xac] ss:$28 sps:$4 sm:$0xff]   ;;  %v1767_v24 = vld [vmem:[%s2257_s3 + $0xb4] ss:$28 sps:$4 sm:$0xff]  }
  0x26   : > { %1588 = vmatprep.subr.bf16.mxu0 %v1717_v28  ;;  %v1762_v25 = vld [vmem:[%s2257_s3 + $0xa8] ss:$28 sps:$4 sm:$0xff]   ;;  %v1765_v26 = vld [vmem:[%s2257_s3 + $0xb0] ss:$28 sps:$4 sm:$0xff]   ;;  %v1773_v28 = vld [vmem:[%s2257_s3 + $0x7c] ss:$28 sps:$4 sm:$0xff]  }
  0x27   : > { %1609 = vmatpush3.bf16.msra.mxu1 %v1716_v27  ;;  %v1770_v27 = vld [vmem:[%s2257_s3 + $0x74] ss:$28 sps:$4 sm:$0xff]   ;;  %v1776_v31 = vld [vmem:[%s2257_s3 + $0x3c] ss:$28 sps:$4 sm:$0xff]   ;;  %v1779_v32 = vld [vmem:[%s2257_s3 + $0x44] ss:$28 sps:$4 sm:$0xff]  }
  0x28   : > { %1610 = vmatprep.subr.bf16.mxu1 %v1719_v30  ;;  %v1771_v30 = vld [vmem:[%s2257_s3 + $0x78] ss:$28 sps:$4 sm:$0xff]   ;;  %v1782_v35 = vld [vmem:[%s2257_s3 + $0x4] ss:$28 sps:$4 sm:$0xff]   ;;  %v1785_v36 = vld [vmem:[%s2257_s3 + $0xc] ss:$28 sps:$4 sm:$0xff]  }
  0x29   : > { %1589 = vmatpush3.bf16.msra.mxu0 %v1718_v29  ;;  %v1768_v29 = vld [vmem:[%s2257_s3 + $0x70] ss:$28 sps:$4 sm:$0xff]   ;;  %v1774_v33 = vld [vmem:[%s2257_s3 + $0x38] ss:$28 sps:$4 sm:$0xff]  }
  0x2a   : > { %1618 = vmatprep.subr.bf16.mxu0 %v1721_v38  ;;  %v1783_v38 = vld [vmem:[%s2257_s3 + $0x8] ss:$28 sps:$4 sm:$0xff]   ;;  %v1788_v39 = vld [vmem:[%s2257_s3 + $0x19c] ss:$28 sps:$4 sm:$0xff]  }
  0x2b   : > { %1611 = vmatpush3.bf16.msra.mxu1 %v1720_v34  ;;  %v1777_v34 = vld [vmem:[%s2257_s3 + $0x40] ss:$28 sps:$4 sm:$0xff]  }
  0x2c   : > { %1651 = vmatprep.subr.bf16.mxu1 %v1826_v43  ;;  %691 = vmatmul.mubr.bf16.vlgmr.msra.gmra.mxu0 %v248_v37  ;;  %v1780_v37 = vld [vmem:[%s2257_s3] ss:$28 sps:$4 sm:$0xff]  }
  0x2d   : > { %1619 = vmatpush3.bf16.msra.mxu0 %v1722_v42  ;;  %772 = vmatprep.mubr.bf16.mxu0 %v253_v61 }
  0x2e   : > { %732 = vmatmul.mubr.bf16.vlgmr.msra.gmra.mxu1 %v250_v46  ;;  %1620 = vmatprep.subr.bf16.mxu0 %v1723_v47 }
  0x2f   : > { %1653 = vmatprep.mubr.msk.bf16.mxu1 %vm1827_vm0, %v1826_v43  ;;  %1652 = vmatpush3.bf16.msra.mxu1 %v1737_v56 }
  0x30   : > { %1214 = vmatprep.subr.bf16.mxu1 %v1740_v8 }
  0x31   : > { %1621 = vmatpush3.bf16.msra.mxu0 %v1724_v48 }
  0x32   : > { %1622 = vmatprep.subr.bf16.mxu0 %v1725_v49 }
  0x35   : > { %1623 = vmatpush3.bf16.msra.mxu0 %v1726_v50 }
  0x36   : > { %1624 = vmatprep.subr.bf16.mxu0 %v1727_v51  ;;  %1654 = vmatmul.mubr.msk.bf16.vlgmr.msra.gmra.mxu1 %vm654_vm1, %v254_v0 }
  0x37   : > { %1215 = vmatpush1.bf16.msra.mxu1 %v1738_v7  ;;  %1246 = vmatprep.mubr.bf16.mxu1 %v1828_v40 }
  0x38   : > { %1216 = vmatprep.subr.bf16.mxu1 %v1746_v11  ;;  %v1786_v11 = vld [vmem:[%s2257_s3 + $0x198] ss:$28 sps:$4 sm:$0xff]  }
  0x39   : > { %1625 = vmatpush3.bf16.msra.mxu0 %v1728_v52 }
  0x3a   : > { %1626 = vmatprep.subr.bf16.mxu0 %v1729_v53 }
  0x3b   : > { %1217 = vmatpush1.bf16.msra.mxu1 %v1744_v13 }
  0x3c   : > { %1218 = vmatprep.subr.bf16.mxu1 %v1752_v15  ;;  %v1790_v15 = vld [vmem:[%s2257_s3 + $0x160] ss:$28 sps:$4 sm:$0xff]  }
  0x3d   : > { %1627 = vmatpush3.bf16.msra.mxu0 %v1730_v54  ;;  %v1465_v54 = vld [vmem:[%s2256_s2] ss:$0 sm:$0xff] }
  0x3e   : > { %1628 = vmatprep.subr.bf16.mxu0 %v1731_v55 }
  0x3f   : > { %1219 = vmatpush1.bf16.msra.mxu1 %v1750_v17  ;;  %v1796_v17 = vld [vmem:[%s2257_s3 + $0x12c] ss:$28 sps:$4 sm:$0xff]  }
  0x40   : > { %1220 = vmatprep.subr.bf16.mxu1 %v1758_v19  ;;  %v1797_v19 = vld [vmem:[%s2257_s3 + $0x130] ss:$28 sps:$4 sm:$0xff]  }
  0x41   : > { %1629 = vmatpush3.bf16.msra.mxu0 %v1732_v58 }
  0x42   : > { %1630 = vmatprep.subr.bf16.mxu0 %v1733_v59 }
  0x43   : > { %1221 = vmatpush1.bf16.msra.mxu1 %v1756_v21  ;;  %v1798_v21 = vld [vmem:[%s2257_s3 + $0xf0] ss:$28 sps:$4 sm:$0xff]  }
  0x44   : > { %1222 = vmatprep.subr.bf16.mxu1 %v1764_v23  ;;  %v1804_v23 = vld [vmem:[%s2257_s3 + $0xbc] ss:$28 sps:$4 sm:$0xff]  }
  0x45   : > { %1631 = vmatpush3.bf16.msra.mxu0 %v1734_v1 }
  0x46   : > { %1632 = vmatprep.subr.bf16.mxu0 %v1735_v2 }
  0x47   : > { %1223 = vmatpush1.bf16.msra.mxu1 %v1762_v25  ;;  %v1805_v25 = vld [vmem:[%s2257_s3 + $0xc0] ss:$28 sps:$4 sm:$0xff]  }
  0x48   : > { %1224 = vmatprep.subr.bf16.mxu1 %v1770_v27  ;;  %v1806_v27 = vld [vmem:[%s2257_s3 + $0x80] ss:$28 sps:$4 sm:$0xff]  }
  0x49   : > { %1633 = vmatpush3.bf16.msra.mxu0 %v1736_v3 }
  0x4a   : > { %1257 = vmatprep.subr.bf16.mxu0 %v1743_v10 }
  0x4b   : > { %1225 = vmatpush1.bf16.msra.mxu1 %v1768_v29  ;;  %v1812_v29 = vld [vmem:[%s2257_s3 + $0x4c] ss:$28 sps:$4 sm:$0xff]  }
  0x4c   : > { %773 = vmatmul.mubr.bf16.vlgmr.msra.gmra.mxu0 %v252_v6  ;;  %1226 = vmatprep.subr.bf16.mxu1 %v1776_v31  ;;  %v1813_v31 = vld [vmem:[%s2257_s3 + $0x50] ss:$28 sps:$4 sm:$0xff]  }
  0x4d   : > { %1258 = vmatpush1.bf16.msra.mxu0 %v1741_v9  ;;  %1289 = vmatprep.mubr.bf16.mxu0 %v1828_v40 }
  0x4e   : > { %1259 = vmatprep.subr.bf16.mxu0 %v1749_v12  ;;  %v1789_v12 = vld [vmem:[%s2257_s3 + $0x1a0] ss:$28 sps:$4 sm:$0xff]  }
  0x4f   : > { %1227 = vmatpush1.bf16.msra.mxu1 %v1774_v33  ;;  %v1814_v33 = vld [vmem:[%s2257_s3 + $0x10] ss:$28 sps:$4 sm:$0xff]  }
  0x50   : > { %1228 = vmatprep.subr.bf16.mxu1 %v1782_v35  ;;  %v891_v35 = vlaneseq }
  0x51   : > { %1260 = vmatpush1.bf16.msra.mxu0 %v1747_v14  ;;  %v1792_v14 = vld [vmem:[%s2257_s3 + $0x164] ss:$28 sps:$4 sm:$0xff]  }
  0x52   : > { %1261 = vmatprep.subr.bf16.mxu0 %v1755_v16  ;;  %v1793_v16 = vld [vmem:[%s2257_s3 + $0x168] ss:$28 sps:$4 sm:$0xff]  }
  0x53   : > { %1229 = vmatpush1.bf16.msra.mxu1 %v1780_v37 }
  0x54   : > { %1300 = vmatprep.subr.bf16.mxu1 %v1788_v39  ;;  %v889_v39 = vld [vmem:[%s2258_s4] sm:$0x7f] }
  0x55   : > { %1262 = vmatpush1.bf16.msra.mxu0 %v1753_v18  ;;  %v1794_v18 = vld [vmem:[%s2257_s3 + $0x128] ss:$28 sps:$4 sm:$0xff]  }
  0x56   : > { %1263 = vmatprep.subr.bf16.mxu0 %v1761_v20  ;;  %v1800_v20 = vld [vmem:[%s2257_s3 + $0xf4] ss:$28 sps:$4 sm:$0xff]  }
  0x59   : > { %1264 = vmatpush1.bf16.msra.mxu0 %v1759_v22  ;;  %v1801_v22 = vld [vmem:[%s2257_s3 + $0xf8] ss:$28 sps:$4 sm:$0xff]  }
  0x5a   : > { %1265 = vmatprep.subr.bf16.mxu0 %v1767_v24  ;;  %v1802_v24 = vld [vmem:[%s2257_s3 + $0xb8] ss:$28 sps:$4 sm:$0xff]  }
  0x5d   : > { %1266 = vmatpush1.bf16.msra.mxu0 %v1765_v26  ;;  %v1808_v26 = vld [vmem:[%s2257_s3 + $0x84] ss:$28 sps:$4 sm:$0xff]  }
  0x5e   : > { %1267 = vmatprep.subr.bf16.mxu0 %v1773_v28  ;;  %v1809_v28 = vld [vmem:[%s2257_s3 + $0x88] ss:$28 sps:$4 sm:$0xff]  }
  0x61   : > { %1268 = vmatpush1.bf16.msra.mxu0 %v1771_v30  ;;  %v1810_v30 = vld [vmem:[%s2257_s3 + $0x48] ss:$28 sps:$4 sm:$0xff]  }
  0x62   : > { %1269 = vmatprep.subr.bf16.mxu0 %v1779_v32  ;;  %v1816_v32 = vld [vmem:[%s2257_s3 + $0x14] ss:$28 sps:$4 sm:$0xff]  }
  0x65   : > { %1270 = vmatpush1.bf16.msra.mxu0 %v1777_v34  ;;  %v1817_v34 = vld [vmem:[%s2257_s3 + $0x18] ss:$28 sps:$4 sm:$0xff]  }
  0x66   : > { %1271 = vmatprep.subr.bf16.mxu0 %v1785_v36  ;;  %v892_v36 = vshrl.u32 %v891_v35, 7 }
  0x68   : > { %v893_v37 = vsub.s32 0, %v892_v36 }
  0x69   : > { %1272 = vmatpush1.bf16.msra.mxu0 %v1783_v38  ;;  %v901_v38 = vsub.s32 2, %v892_v36 }
  0x6a   : > { %1657 = vmatprep.subr.bf16.mxu0 %v1826_v43 }
  0xec   : > { %v1590_v45 = vpop.f32.mrf.mxu0 }
  0xee   : > { %v1612_v41 = vpop.f32.mrf.mxu1  ;;  %v1591_v47 = vpop.f32.mrf.mxu0 }
  0xef   : > { %v1592_v53 = vadd.f32 %v1591_v47, %v1590_v45 }
  0xf0   : > { %v1613_v42 = vpop.f32.mrf.mxu1  ;;  %v1593_v50 = vpop.f32.mrf.mxu0 }
  0xf1   : > { %v693_v56 = vadd.f32 %v1592_v53, %v1465_v54  ;;  %v1614_v57 = vadd.f32 %v1613_v42, %v1612_v41  ;;  %v905_v41 = vsub.s32 3, %v892_v36  ;;  %v894_v42 = vrot.slane %v889_v39, %v893_v37 }
  0xf2   : > { %v1615_v44 = vpop.f32.mrf.mxu1  ;;  %v1594_v55 = vpop.f32.mrf.mxu0 }
  0xf3   : > { %v1595_v58 = vadd.f32 %v1594_v55, %v1593_v50  ;;  %v734_v61 = vadd.f32 %v1614_v57, %v693_v56 }
  0xf4   : > { %v1616_v46 = vpop.f32.mrf.mxu1 }
  0xf5   : > { %v696_v62 = vadd.f32 %v1595_v58, %v1465_v54  ;;  %v1617_v63 = vadd.f32 %v1616_v46, %v1615_v44  ;;  %v902_v44 = vrot.slane %v889_v39, %v901_v38  ;;  %v906_v46 = vrot.slane %v889_v39, %v905_v41 }
  0xf6   : > { %v815_v48 = vpop.f32.mrf.mxu1 }
  0xf7   : > { %v737_v4 = vadd.f32 %v1617_v63, %v696_v62  ;;  %v909_v62 = vsub.s32 4, %v892_v36  ;;  %v917_v63 = vsub.s32 6, %v892_v36 }
  0xf8   : > { %v1655_v49 = vpop.f32.mrf.mxu1 }
  0xfa   : > { %v818_v51 = vpop.f32.mrf.mxu1 }
  0xfc   : > { %v1656_v52 = vpop.f32.mrf.mxu1 }
 0x10c   : > { %v1634_v59 = vpop.f32.mrf.mxu0 }
 0x10e   : > { %v1635_v60 = vpop.f32.mrf.mxu0 }
 0x10f   : > { %v1636_v0 = vadd.f32 %v1635_v60, %v1634_v59 }
 0x110   : > { %v1637_v1 = vpop.f32.mrf.mxu0 }
 0x111   : > { %v775_v2 = vadd.f32 %v1636_v0, %v734_v61  ;;  %v913_v0 = vsub.s32 5, %v892_v36 }
 0x112   : > { %v1638_v3 = vpop.f32.mrf.mxu0 }
 0x113   : > { %v1639_v5 = vadd.f32 %v1638_v3, %v1637_v1  ;;  %v816_v6 = vadd.f32 %v815_v48, %v775_v2  ;;  %v910_v1 = vrot.slane %v889_v39, %v909_v62  ;;  %v918_v2 = vrot.slane %v889_v39, %v917_v63 }
 0x114   : > { %v914_v3 = vrot.slane %v889_v39, %v913_v0 }
 0x115   : > { %v778_v7 = vadd.f32 %v1639_v5, %v737_v4  ;;  %v822_v9 = vmax.f32 %v816_v6, 0.0 }
 0x117   : > { %v819_v8 = vadd.f32 %v818_v51, %v778_v7 }
 0x119   : > { %v823_v10 = vmax.f32 %v819_v8, 0.0 }
 0x11b   : > { %v824_v13 = vpack.c.bf16 %v823_v10, %v822_v9 }
 0x11d   : > { %1247 = vmatmul.mubr.bf16.vlgmr.msra.gmra.mxu1 %v824_v13  ;;  %1290 = vmatmul.mubr.bf16.vlgmr.msra.gmra.mxu0 %v824_v13 }
 0x11e   : > { %1301 = vmatpush1.bf16.msra.mxu1 %v1786_v11  ;;  %1658 = vmatpush3.bf16.msra.mxu0 %v1789_v12 }
 0x11f   : > { %1302 = vmatprep.subr.bf16.mxu1 %v1792_v14  ;;  %1659 = vmatprep.subr.bf16.mxu0 %v1826_v43 }
 0x120   : > { %1332 = vmatprep.mubr.bf16.mxu1 %v1828_v40  ;;  %1673 = vmatprep.mubr.msk.bf16.mxu0 %vm1827_vm0, %v1826_v43  ;;  %v897_v40 = vsub.s32 1, %v892_v36 }
 0x122   : > { %1303 = vmatpush1.bf16.msra.mxu1 %v1790_v15  ;;  %1660 = vmatpush3.bf16.msra.mxu0 %v1793_v16  ;;  %v898_v45 = vrot.slane %v889_v39, %v897_v40 }
 0x123   : > { %1304 = vmatprep.subr.bf16.mxu1 %v1796_v17  ;;  %1661 = vmatprep.subr.bf16.mxu0 %v1826_v43 }
 0x126   : > { %1305 = vmatpush1.bf16.msra.mxu1 %v1794_v18  ;;  %1662 = vmatpush3.bf16.msra.mxu0 %v1797_v19 }
 0x127   : > { %1306 = vmatprep.subr.bf16.mxu1 %v1800_v20  ;;  %1663 = vmatprep.subr.bf16.mxu0 %v1826_v43 }
 0x12a   : > { %1307 = vmatpush1.bf16.msra.mxu1 %v1798_v21  ;;  %1664 = vmatpush3.bf16.msra.mxu0 %v1801_v22 }
 0x12b   : > { %1308 = vmatprep.subr.bf16.mxu1 %v1804_v23  ;;  %1665 = vmatprep.subr.bf16.mxu0 %v1826_v43 }
 0x12e   : > { %1309 = vmatpush1.bf16.msra.mxu1 %v1802_v24  ;;  %1666 = vmatpush3.bf16.msra.mxu0 %v1805_v25 }
 0x12f   : > { %1310 = vmatprep.subr.bf16.mxu1 %v1808_v26  ;;  %1667 = vmatprep.subr.bf16.mxu0 %v1826_v43 }
 0x132   : > { %1311 = vmatpush1.bf16.msra.mxu1 %v1806_v27  ;;  %1668 = vmatpush3.bf16.msra.mxu0 %v1809_v28 }
 0x133   : > { %1312 = vmatprep.subr.bf16.mxu1 %v1812_v29  ;;  %1669 = vmatprep.subr.bf16.mxu0 %v1826_v43 }
 0x136   : > { %1313 = vmatpush1.bf16.msra.mxu1 %v1810_v30  ;;  %1670 = vmatpush3.bf16.msra.mxu0 %v1813_v31 }
 0x137   : > { %1314 = vmatprep.subr.bf16.mxu1 %v1816_v32  ;;  %1671 = vmatprep.subr.bf16.mxu0 %v1826_v43 }
 0x13a   : > { %1315 = vmatpush1.bf16.msra.mxu1 %v1814_v33  ;;  %1672 = vmatpush3.bf16.msra.mxu0 %v1817_v34 }
 0x13d   : > { %1333 = vmatmul.mubr.bf16.vlgmr.msra.gmra.mxu1 %v824_v13  ;;  %1674 = vmatmul.mubr.bf16.vlgmr.msra.gmra.mxu0 %v824_v13 }
 0x1dd   : > { %v1248_v43 = vpop.f32.mrf.mxu1  ;;  %v1291_v47 = vpop.f32.mrf.mxu0 }
 0x1de   : > { %v1249_v48 = vadd.f32 %v1248_v43, %v894_v42  ;;  %v1292_v49 = vadd.f32 %v1291_v47, %v902_v44 }
 0x1df   : > { %v1250_v50 = vpop.f32.mrf.mxu1  ;;  %v1293_v51 = vpop.f32.mrf.mxu0 }
 0x1e0   : > { %1384 = vst [vmem:[%s2233_s10] sm:$0xff] %v1249_v48  ;;  %1386 = vst [vmem:[%s2233_s10 + $0x10] sm:$0xff] %v1292_v49  ;;  %v1251_v52 = vadd.f32 %v1250_v50, %v898_v45  ;;  %v1294_v53 = vadd.f32 %v1293_v51, %v906_v46 }
 0x1e1   : > { %v1252_v54 = vpop.f32.mrf.mxu1  ;;  %v1295_v55 = vpop.f32.mrf.mxu0 }
 0x1e2   : > { %1385 = vst [vmem:[%s2233_s10 + $0x8] sm:$0xff] %v1251_v52  ;;  %1387 = vst [vmem:[%s2233_s10 + $0x18] sm:$0xff] %v1294_v53  ;;  %v1253_v56 = vadd.f32 %v1252_v54, %v894_v42  ;;  %v1296_v57 = vadd.f32 %v1295_v55, %v902_v44 }
 0x1e3   : > { %v1254_v58 = vpop.f32.mrf.mxu1  ;;  %v1297_v59 = vpop.f32.mrf.mxu0 }
 0x1e4   : > { %1391 = vst [vmem:[%s2233_s10 + $0x38] sm:$0xff] %v1253_v56  ;;  %1393 = vst [vmem:[%s2233_s10 + $0x48] sm:$0xff] %v1296_v57  ;;  %v1255_v60 = vadd.f32 %v1254_v58, %v898_v45  ;;  %v1298_v61 = vadd.f32 %v1297_v59, %v906_v46 }
 0x1e6   : > { %1392 = vst [vmem:[%s2233_s10 + $0x40] sm:$0xff] %v1255_v60  ;;  %1394 = vst [vmem:[%s2233_s10 + $0x50] sm:$0xff] %v1298_v61 }
 0x1fd   : > { %v1334_v4 = vpop.f32.mrf.mxu1  ;;  %v1377_v5 = vpop.f32.mrf.mxu0 }
 0x1fe   : > { %v1335_v6 = vadd.f32 %v1334_v4, %v910_v1  ;;  %v1378_v7 = vadd.f32 %v1377_v5, %v918_v2 }
 0x1ff   : > { %v1336_v8 = vpop.f32.mrf.mxu1  ;;  %v1675_v9 = vpop.f32.mrf.mxu0 }
 0x200   : > { %1388 = vst [vmem:[%s2233_s10 + $0x20] sm:$0xff] %v1335_v6  ;;  %1390 = vst.msk [vmem:[%s2233_s10 + $0x30] sm:$0xff] %vm654_vm1, %v1378_v7  ;;  %v1337_v10 = vadd.f32 %v1336_v8, %v914_v3 }
 0x201   : > { %v1338_v11 = vpop.f32.mrf.mxu1  ;;  %v1380_v12 = vpop.f32.mrf.mxu0 }
 0x202   : > { %1389 = vst [vmem:[%s2233_s10 + $0x28] sm:$0xff] %v1337_v10  ;;  %v1339_v13 = vadd.f32 %v1338_v11, %v910_v1  ;;  %v1381_v14 = vadd.f32 %v1380_v12, %v918_v2 }
 0x203   : > { %v1340_v15 = vpop.f32.mrf.mxu1  ;;  %v1676_v16 = vpop.f32.mrf.mxu0 }
 0x204   : > { %1395 = vst [vmem:[%s2233_s10 + $0x58] sm:$0xff] %v1339_v13  ;;  %1397 = vst.msk [vmem:[%s2233_s10 + $0x68] sm:$0xff] %vm654_vm1, %v1381_v14  ;;  %v1341_v17 = vadd.f32 %v1340_v15, %v914_v3 }
 0x206   : > { %1396 = vst [vmem:[%s2233_s10 + $0x60] sm:$0xff] %v1341_v17 }
 0x207 PF: > { %s15_s18 = sadd.s32 1, %s1824_s18  }
 0x208   : > { %p12_p4 = scmp.ge.s32.totalorder %s15_s18, 4  }
 0x20a   :  { %14 = sbr.rel (!%p12_p4) target bundleno = 1 (0x1), region = 70 }

</bundles_post_ra>
